<compile_context>
chip_gen: v5e
topology: v5e:2x2
jax: 0.10.0
libtpu: 0.0.40
codegen_flags: <defaults>
</compile_context>

<pallas_src>
import functools

import jax
import jax.numpy as jnp
from jax.experimental import pallas as pl
from jax.experimental.pallas import tpu as pltpu


def _round_up(x, m):
    return (x + m - 1) // m * m


def model_kernel(emb_ref, enc_w_ref, dec_w_ref, tbl_ref, out_ref, rows_scratch):
    """Fused encode -> decode -> logits for one vocab tile.

    emb_ref:      [Bp, P*D]   gathered prompt embeddings (compute dtype), grid-invariant
    enc_w_ref:    [P*D, D]    flattened encode weights   (compute dtype), grid-invariant
    dec_w_ref:    [D, R*D]    packed decode weights      (compute dtype), grid-invariant
    tbl_ref:      [D, TV]     transposed embedding-table tile (compute dtype), streamed
    out_ref:      [R*Bp, TV]  logits rows for this vocab tile, row = r*Bp + b  (float32)
    rows_scratch: [R*Bp, D]   float32 VMEM scratch
    """
    Bp = emb_ref.shape[0]
    D = enc_w_ref.shape[1]
    R = dec_w_ref.shape[1] // D
    cdt = emb_ref.dtype

    # Stage 1: encode -- ONE MXU matmul, contraction K = P*D.
    encoded = jnp.dot(emb_ref[...], enc_w_ref[...],
                      preferred_element_type=jnp.float32)             # [Bp, D] f32

    # Stage 2: decode -- ONE matmul covering all R response positions.
    dec = jnp.dot(encoded.astype(cdt), dec_w_ref[...],
                  preferred_element_type=jnp.float32)                 # [Bp, R*D] f32

    # Repack [Bp, R*D] -> [R*Bp, D] with sublane-aligned static slice copies
    # (Bp is a multiple of 8, so each copy is a full-sublane [8, D] block).
    # TODO(synk): a single pltpu.einshape relayout could keep this entirely in
    # the XLU slot once its grouped-equation lowering is verified here.
    for r in range(R):
        rows_scratch[r * Bp:(r + 1) * Bp, :] = dec[:, r * D:(r + 1) * D]

    # Stage 3: logits for this vocab tile -- ONE matmul (M = R*Bp rows), one
    # fully lane-dense block store (TV is a multiple of 128).
    out_ref[...] = jnp.dot(rows_scratch[...].astype(cdt), tbl_ref[...],
                           preferred_element_type=jnp.float32)        # [R*Bp, TV]


def pack_params(emb_table, encode_weights, decode_weights, *,
                compute_dtype=jnp.bfloat16):
    """Pre-pack weights ONCE (outside the per-step forward): lane-dense, padded, cast."""
    V, D = emb_table.shape
    P = encode_weights.shape[0]
    R = decode_weights.shape[0]
    Vp = _round_up(V, 128)

    enc_w_flat = encode_weights.reshape(P * D, D).astype(compute_dtype)      # [P*D, D]
    dec_w_packed = jnp.transpose(decode_weights, (1, 0, 2)).reshape(
        D, R * D).astype(compute_dtype)                                      # [D, R*D]
    # Transposed, vocab-padded table: padded logits columns are zero and are
    # sliced off in the wrapper.
    tbl_t = jnp.zeros((D, Vp), compute_dtype).at[:, :V].set(
        emb_table.T.astype(compute_dtype))                                   # [D, Vp]
    return enc_w_flat, dec_w_packed, tbl_t


@jax.jit
def model_forward(prompts, emb_table, enc_w_flat, dec_w_packed, tbl_t):
    """prompts: int32[B, P] -> logits float32[B, R, V]."""
    B, P = prompts.shape
    V, D = emb_table.shape
    R = dec_w_packed.shape[1] // D
    Vp = tbl_t.shape[1]
    cdt = tbl_t.dtype

    Bp = _round_up(B, 8)          # sublane-aligned batch (padded rows -> zero logits)
    ROWS = R * Bp

    # TODO(synk): the embedding row gather (data-dependent indexing) stays in
    # XLA; an in-kernel scalar-prefetch per-row DMA fallback would serialize
    # into B*P tiny copies at these sizes.
    embeddings = jnp.take(emb_table, prompts, axis=0)                 # [B, P, D]
    emb_flat = embeddings.reshape(B, P * D).astype(cdt)               # [B, P*D]
    if Bp != B:
        emb_flat = jnp.zeros((Bp, P * D), cdt).at[:B, :].set(emb_flat)

    # Vocab tile size: lane-dense multiple of 128, capped so double-buffered
    # table + output tiles stay small (re-derive for real V / per generation).
    if Vp % 512 == 0:
        TV = 512
    elif Vp % 256 == 0:
        TV = 256
    else:
        TV = 128

    # Scoped-VMEM budget from the actual footprint (double-buffered inputs +
    # output tile + scratch), with 2x headroom; covers v5e's 16 MiB default
    # and stays within v7x's 64 MiB physical VMEM.
    itemsize = jnp.dtype(cdt).itemsize
    vmem_bytes = (2 * (Bp * P * D + P * D * D + D * R * D + D * TV) * itemsize
                  + 2 * ROWS * TV * 4 + ROWS * D * 4)
    vmem_limit = int(min(max(2 * vmem_bytes, 16 * 1024 * 1024), 64 * 1024 * 1024))

    out_rows = pl.pallas_call(
        model_kernel,
        out_shape=jax.ShapeDtypeStruct((ROWS, Vp), jnp.float32),
        grid=(Vp // TV,),                                   # stream vocab tiles
        in_specs=[
            pl.BlockSpec((Bp, P * D), lambda v: (0, 0)),    # embeddings (invariant)
            pl.BlockSpec((P * D, D), lambda v: (0, 0)),     # encode weights (invariant)
            pl.BlockSpec((D, R * D), lambda v: (0, 0)),     # decode weights (invariant)
            pl.BlockSpec((D, TV), lambda v: (0, v)),        # table tile (streamed)
        ],
        out_specs=pl.BlockSpec((ROWS, TV), lambda v: (0, v)),
        scratch_shapes=[pltpu.VMEM((ROWS, D), jnp.float32)],
        compiler_params=pltpu.CompilerParams(
            dimension_semantics=("parallel",),              # v7x megacore over V
            vmem_limit_bytes=vmem_limit),
    )(emb_flat, enc_w_flat, dec_w_packed, tbl_t)

    # Row r*Bp + b, column v  ->  logits[b, r, v]; strip batch / vocab padding.
    # TODO(synk): writing the [B, R, V] layout directly from the kernel needs an
    # in-kernel sublane transpose (or per-r masked stores); at these shapes the
    # XLA transpose below is negligible, so the kernel keeps clean block stores.
    out = out_rows.reshape(R, Bp, Vp)[:, :B, :V]
    return jnp.transpose(out, (1, 0, 2))


def reference_forward(prompts, emb_table, encode_weights, decode_weights):
    embeddings = jnp.take(emb_table, prompts, axis=0)                  # [B, P, D]
    encoded = jnp.einsum('bpd,pde->be', embeddings, encode_weights)    # [B, D]
    decoded = jnp.einsum('be,ped->bpd', encoded, decode_weights)       # [B, R, D]
    logits = jnp.einsum('bpd,vd->bpv', decoded, emb_table)             # [B, R, V]
    return logits


if __name__ == "__main__":
    # Small, deterministic configuration.
    vocab_size = 64
    embedding_dim = 32
    prompt_length = 8
    response_length = 8
    batch = 2

    key = jax.random.PRNGKey(0)
    k_emb, k_enc, k_dec, k_prompt = jax.random.split(key, 4)

    # nn.Embedding weight ~ N(0, 1)
    emb_table = jax.random.normal(k_emb, (vocab_size, embedding_dim),
                                  dtype=jnp.float32)
    # torch.randn(P, D, D) / sqrt(D)
    encode_weights = jax.random.normal(
        k_enc, (prompt_length, embedding_dim, embedding_dim),
        dtype=jnp.float32) / jnp.sqrt(jnp.float32(embedding_dim))
    decode_weights = jax.random.normal(
        k_dec, (response_length, embedding_dim, embedding_dim),
        dtype=jnp.float32) / jnp.sqrt(jnp.float32(embedding_dim))

    prompts = jax.random.randint(k_prompt, (batch, prompt_length),
                                 0, vocab_size, dtype=jnp.int32)

    ref = reference_forward(prompts, emb_table, encode_weights, decode_weights)

    # Full-precision compute path: tight check against the XLA reference.
    packed_f32 = pack_params(emb_table, encode_weights, decode_weights,
                             compute_dtype=jnp.float32)
    logits_f32 = jax.block_until_ready(
        model_forward(prompts, emb_table, *packed_f32))
    assert logits_f32.shape == (batch, response_length, vocab_size)
    assert jnp.allclose(logits_f32, ref, atol=2e-3, rtol=2e-3)

    # bf16 matmul path (v6e/v7x fast path): f32 MXU accumulation, looser tol.
    packed_bf16 = pack_params(emb_table, encode_weights, decode_weights,
                              compute_dtype=jnp.bfloat16)
    logits_bf16 = jax.block_until_ready(
        model_forward(prompts, emb_table, *packed_bf16))
    assert logits_bf16.shape == (batch, response_length, vocab_size)
    assert jnp.allclose(logits_bf16, ref, atol=1.0, rtol=0.05)

    print("KERNEL_OK")
</pallas_src>

<mosaic_0001>
module attributes {stable_mosaic.version = 11 : i64} {
  func.func @model_kernel(%arg0: i32, %arg1: memref<8x256xf32, #tpu.memory_space<vmem>>, %arg2: memref<256x32xf32, #tpu.memory_space<vmem>>, %arg3: memref<32x256xf32, #tpu.memory_space<vmem>>, %arg4: memref<32x128xf32, #tpu.memory_space<vmem>>, %arg5: memref<64x128xf32, #tpu.memory_space<vmem>>, %arg6: memref<64x32xf32, #tpu.memory_space<vmem>>) attributes {dimension_semantics = [#tpu.dimension_semantics<parallel>], iteration_bounds = array<i64: 1>, scalar_prefetch = 0 : i64, scratch_operands = 1 : i64, tpu.core_type = #tpu.core_type<tc>, window_params = [{pipeline_mode = #tpu.pipeline_mode<synchronous>, transform_indices = @transform_0, window_bounds = array<i64: 8, 256>}, {pipeline_mode = #tpu.pipeline_mode<synchronous>, transform_indices = @transform_1, window_bounds = array<i64: 256, 32>}, {pipeline_mode = #tpu.pipeline_mode<synchronous>, transform_indices = @transform_2, window_bounds = array<i64: 32, 256>}, {transform_indices = @transform_3, window_bounds = array<i64: 32, 128>}, {transform_indices = @transform_4, window_bounds = array<i64: 64, 128>}]} {
    %c0 = arith.constant 0 : index
    %c0_0 = arith.constant 0 : index
    %0 = vector.load %arg1[%c0, %c0_0] : memref<8x256xf32, #tpu.memory_space<vmem>>, vector<8x256xf32>
    %c0_1 = arith.constant 0 : index
    %c0_2 = arith.constant 0 : index
    %1 = vector.load %arg2[%c0_1, %c0_2] : memref<256x32xf32, #tpu.memory_space<vmem>>, vector<256x32xf32>
    %cst = arith.constant dense<0.000000e+00> : vector<8x32xf32>
    %2 = tpu.matmul %0, %1, %cst {dimension_numbers = #tpu.dot_dimension_numbers<[1], [0], [0], [1], [0, 0, 1, 1], [], []>} : vector<8x256xf32>, vector<256x32xf32>, vector<8x32xf32> -> vector<8x32xf32>
    %c0_3 = arith.constant 0 : index
    %c0_4 = arith.constant 0 : index
    %3 = vector.load %arg3[%c0_3, %c0_4] : memref<32x256xf32, #tpu.memory_space<vmem>>, vector<32x256xf32>
    %cst_5 = arith.constant dense<0.000000e+00> : vector<8x256xf32>
    %4 = tpu.matmul %2, %3, %cst_5 {dimension_numbers = #tpu.dot_dimension_numbers<[1], [0], [0], [1], [0, 0, 1, 1], [], []>} : vector<8x32xf32>, vector<32x256xf32>, vector<8x256xf32> -> vector<8x256xf32>
    %5 = vector.extract_strided_slice %4 {offsets = [0, 0], sizes = [8, 32], strides = [1, 1]} : vector<8x256xf32> to vector<8x32xf32>
    %c0_6 = arith.constant 0 : index
    %c0_7 = arith.constant 0 : index
    %6 = vector.load %arg6[%c0_6, %c0_7] : memref<64x32xf32, #tpu.memory_space<vmem>>, vector<8x32xf32>
    tpu.vector_store %arg6[%c0_6, %c0_7], %5 {strides = array<i32>} : memref<64x32xf32, #tpu.memory_space<vmem>>, vector<8x32xf32>,
    %7 = vector.extract_strided_slice %4 {offsets = [0, 32], sizes = [8, 32], strides = [1, 1]} : vector<8x256xf32> to vector<8x32xf32>
    %c8 = arith.constant 8 : index
    %c0_8 = arith.constant 0 : index
    %8 = vector.load %arg6[%c8, %c0_8] : memref<64x32xf32, #tpu.memory_space<vmem>>, vector<8x32xf32>
    tpu.vector_store %arg6[%c8, %c0_8], %7 {strides = array<i32>} : memref<64x32xf32, #tpu.memory_space<vmem>>, vector<8x32xf32>,
    %9 = vector.extract_strided_slice %4 {offsets = [0, 64], sizes = [8, 32], strides = [1, 1]} : vector<8x256xf32> to vector<8x32xf32>
    %c16 = arith.constant 16 : index
    %c0_9 = arith.constant 0 : index
    %10 = vector.load %arg6[%c16, %c0_9] : memref<64x32xf32, #tpu.memory_space<vmem>>, vector<8x32xf32>
    tpu.vector_store %arg6[%c16, %c0_9], %9 {strides = array<i32>} : memref<64x32xf32, #tpu.memory_space<vmem>>, vector<8x32xf32>,
    %11 = vector.extract_strided_slice %4 {offsets = [0, 96], sizes = [8, 32], strides = [1, 1]} : vector<8x256xf32> to vector<8x32xf32>
    %c24 = arith.constant 24 : index
    %c0_10 = arith.constant 0 : index
    %12 = vector.load %arg6[%c24, %c0_10] : memref<64x32xf32, #tpu.memory_space<vmem>>, vector<8x32xf32>
    tpu.vector_store %arg6[%c24, %c0_10], %11 {strides = array<i32>} : memref<64x32xf32, #tpu.memory_space<vmem>>, vector<8x32xf32>,
    %13 = vector.extract_strided_slice %4 {offsets = [0, 128], sizes = [8, 32], strides = [1, 1]} : vector<8x256xf32> to vector<8x32xf32>
    %c32 = arith.constant 32 : index
    %c0_11 = arith.constant 0 : index
    %14 = vector.load %arg6[%c32, %c0_11] : memref<64x32xf32, #tpu.memory_space<vmem>>, vector<8x32xf32>
    tpu.vector_store %arg6[%c32, %c0_11], %13 {strides = array<i32>} : memref<64x32xf32, #tpu.memory_space<vmem>>, vector<8x32xf32>,
    %15 = vector.extract_strided_slice %4 {offsets = [0, 160], sizes = [8, 32], strides = [1, 1]} : vector<8x256xf32> to vector<8x32xf32>
    %c40 = arith.constant 40 : index
    %c0_12 = arith.constant 0 : index
    %16 = vector.load %arg6[%c40, %c0_12] : memref<64x32xf32, #tpu.memory_space<vmem>>, vector<8x32xf32>
    tpu.vector_store %arg6[%c40, %c0_12], %15 {strides = array<i32>} : memref<64x32xf32, #tpu.memory_space<vmem>>, vector<8x32xf32>,
    %17 = vector.extract_strided_slice %4 {offsets = [0, 192], sizes = [8, 32], strides = [1, 1]} : vector<8x256xf32> to vector<8x32xf32>
    %c48 = arith.constant 48 : index
    %c0_13 = arith.constant 0 : index
    %18 = vector.load %arg6[%c48, %c0_13] : memref<64x32xf32, #tpu.memory_space<vmem>>, vector<8x32xf32>
    tpu.vector_store %arg6[%c48, %c0_13], %17 {strides = array<i32>} : memref<64x32xf32, #tpu.memory_space<vmem>>, vector<8x32xf32>,
    %19 = vector.extract_strided_slice %4 {offsets = [0, 224], sizes = [8, 32], strides = [1, 1]} : vector<8x256xf32> to vector<8x32xf32>
    %c56 = arith.constant 56 : index
    %c0_14 = arith.constant 0 : index
    %20 = vector.load %arg6[%c56, %c0_14] : memref<64x32xf32, #tpu.memory_space<vmem>>, vector<8x32xf32>
    tpu.vector_store %arg6[%c56, %c0_14], %19 {strides = array<i32>} : memref<64x32xf32, #tpu.memory_space<vmem>>, vector<8x32xf32>,
    %c0_15 = arith.constant 0 : index
    %c0_16 = arith.constant 0 : index
    %21 = vector.load %arg6[%c0_15, %c0_16] : memref<64x32xf32, #tpu.memory_space<vmem>>, vector<64x32xf32>
    %c0_17 = arith.constant 0 : index
    %c0_18 = arith.constant 0 : index
    %22 = vector.load %arg4[%c0_17, %c0_18] : memref<32x128xf32, #tpu.memory_space<vmem>>, vector<32x128xf32>
    %cst_19 = arith.constant dense<0.000000e+00> : vector<64x128xf32>
    %23 = tpu.matmul %21, %22, %cst_19 {dimension_numbers = #tpu.dot_dimension_numbers<[1], [0], [0], [1], [0, 0, 1, 1], [], []>} : vector<64x32xf32>, vector<32x128xf32>, vector<64x128xf32> -> vector<64x128xf32>
    %c0_20 = arith.constant 0 : index
    %c0_21 = arith.constant 0 : index
    %24 = vector.load %arg5[%c0_20, %c0_21] : memref<64x128xf32, #tpu.memory_space<vmem>>, vector<64x128xf32>
    tpu.vector_store %arg5[%c0_20, %c0_21], %23 {strides = array<i32>} : memref<64x128xf32, #tpu.memory_space<vmem>>, vector<64x128xf32>,
    return
  }
  func.func @transform_0(%arg0: i32) -> (i32, i32) {
    %c0_i32 = arith.constant 0 : i32
    %c0_i32_0 = arith.constant 0 : i32
    %c0_i32_1 = arith.constant 0 : i32
    return %c0_i32, %c0_i32_0 : i32, i32
  }
  func.func @transform_1(%arg0: i32) -> (i32, i32) {
    %c0_i32 = arith.constant 0 : i32
    %c0_i32_0 = arith.constant 0 : i32
    %c0_i32_1 = arith.constant 0 : i32
    return %c0_i32, %c0_i32_0 : i32, i32
  }
  func.func @transform_2(%arg0: i32) -> (i32, i32) {
    %c0_i32 = arith.constant 0 : i32
    %c0_i32_0 = arith.constant 0 : i32
    %c0_i32_1 = arith.constant 0 : i32
    return %c0_i32, %c0_i32_0 : i32, i32
  }
  func.func @transform_3(%arg0: i32) -> (i32, i32) {
    %c0_i32 = arith.constant 0 : i32
    %c0_i32_0 = arith.constant 0 : i32
    return %c0_i32, %arg0 : i32, i32
  }
  func.func @transform_4(%arg0: i32) -> (i32, i32) {
    %c0_i32 = arith.constant 0 : i32
    %c0_i32_0 = arith.constant 0 : i32
    return %c0_i32, %arg0 : i32, i32
  }
}

</mosaic_0001>

<bundles_post_ra>
// kernel: model_forward.1
= control target key start
LH: loop header
LB: loop body
LE: loop exit
PB: predicated region body
PF: predicated region fallthrough
CT: control target
= control target key end

     0   :  { %vm99_vm0 = vcmask 261120   ;;  %s277_s26 = smov 32   ;;  %s278_s27 = smov 64   ;;  %s485_s1 = inlined_call_operand.vmem [shape: f32[256,32], index: 1, kind: input, shape index: {}]   ;;  %s486_s2 = inlined_call_operand.vmem [shape: f32[32,256], index: 2, kind: input, shape index: {}]   ;;  %s487_s0 = inlined_call_operand.vmem [shape: f32[8,256], index: 0, kind: input, shape index: {}]   ;;  %s488_s3 = inlined_call_operand.vmem [shape: f32[32,128], index: 3, kind: input, shape index: {}]   ;;  %s489_s4 = inlined_call_operand.vmem [shape: f32[64,128], index: 4, kind: output, shape index: {}]  }
   0x1   :  { %v34_v0 = vld [vmem:[%s485_s1 + $0x78] sm:$0xff]  ;;  %v33_v2 = vld [vmem:[%s485_s1 + $0x70] sm:$0xff]  ;;  %v32_v4 = vld [vmem:[%s485_s1 + $0x68] sm:$0xff]  ;;  %s279_s28 = smov 96  }
   0x2   :  { %v50_v1 = vld [vmem:[%s485_s1 + $0xf8] sm:$0xff]  ;;  %51 = vmatpush.msra.mxu0 %v34_v0  ;;  %v49_v3 = vld [vmem:[%s485_s1 + $0xf0] sm:$0xff]  ;;  %v48_v5 = vld [vmem:[%s485_s1 + $0xe8] sm:$0xff] }
   0x3   :  { %71 = vmatpush.msra.mxu1 %v50_v1  ;;  %v31_v6 = vld [vmem:[%s485_s1 + $0x60] sm:$0xff]  ;;  %v30_v8 = vld [vmem:[%s485_s1 + $0x58] sm:$0xff]  ;;  %v29_v10 = vld [vmem:[%s485_s1 + $0x50] sm:$0xff] }
   0x4   :  { %52 = vmatpush.msra.mxu0 %v33_v2  ;;  %v47_v7 = vld [vmem:[%s485_s1 + $0xe0] sm:$0xff]  ;;  %v46_v9 = vld [vmem:[%s485_s1 + $0xd8] sm:$0xff]  ;;  %v45_v11 = vld [vmem:[%s485_s1 + $0xd0] sm:$0xff] }
   0x5   :  { %72 = vmatpush.msra.mxu1 %v49_v3  ;;  %v28_v12 = vld [vmem:[%s485_s1 + $0x48] sm:$0xff]  ;;  %v27_v14 = vld [vmem:[%s485_s1 + $0x40] sm:$0xff]  ;;  %v97_v15 = vld [vmem:[%s486_s2 + $0x30] sm:$0xff] }
   0x6   :  { %53 = vmatpush.msra.mxu0 %v32_v4  ;;  %v44_v13 = vld [vmem:[%s485_s1 + $0xc8] sm:$0xff]  ;;  %v98_v16 = vld [vmem:[%s486_s2 + $0x38] sm:$0xff]  ;;  %v43_v17 = vld [vmem:[%s485_s1 + $0xc0] sm:$0xff]  ;;  %115 = vmatpush.msra.mxu2 %v97_v15 }
   0x7   :  { %73 = vmatpush.msra.mxu1 %v48_v5  ;;  %135 = vmatpush.msra.mxu3 %v98_v16  ;;  %v95_v18 = vld [vmem:[%s486_s2 + $0x20] sm:$0xff]  ;;  %v96_v19 = vld [vmem:[%s486_s2 + $0x28] sm:$0xff]  ;;  %v26_v20 = vld [vmem:[%s485_s1 + $0x38] sm:$0xff] }
   0x8   :  { %54 = vmatpush.msra.mxu0 %v31_v6  ;;  %v42_v21 = vld [vmem:[%s485_s1 + $0xb8] sm:$0xff]  ;;  %116 = vmatpush.msra.mxu2 %v95_v18  ;;  %v25_v22 = vld [vmem:[%s485_s1 + $0x30] sm:$0xff]  ;;  %v24_v24 = vld [vmem:[%s485_s1 + $0x28] sm:$0xff] }
   0x9   :  { %74 = vmatpush.msra.mxu1 %v47_v7  ;;  %136 = vmatpush.msra.mxu3 %v96_v19  ;;  %v41_v23 = vld [vmem:[%s485_s1 + $0xb0] sm:$0xff]  ;;  %v40_v25 = vld [vmem:[%s485_s1 + $0xa8] sm:$0xff]  ;;  %v23_v26 = vld [vmem:[%s485_s1 + $0x20] sm:$0xff] }
   0xa   :  { %55 = vmatpush.msra.mxu0 %v30_v8  ;;  %v39_v27 = vld [vmem:[%s485_s1 + $0xa0] sm:$0xff]  ;;  %v22_v28 = vld [vmem:[%s485_s1 + $0x18] sm:$0xff]  ;;  %v21_v30 = vld [vmem:[%s485_s1 + $0x10] sm:$0xff] }
   0xb   :  { %75 = vmatpush.msra.mxu1 %v46_v9  ;;  %v38_v29 = vld [vmem:[%s485_s1 + $0x98] sm:$0xff]  ;;  %v37_v31 = vld [vmem:[%s485_s1 + $0x90] sm:$0xff]  ;;  %v20_v32 = vld [vmem:[%s485_s1 + $0x8] sm:$0xff] }
   0xc   :  { %56 = vmatpush.msra.mxu0 %v29_v10  ;;  %v36_v33 = vld [vmem:[%s485_s1 + $0x88] sm:$0xff]  ;;  %v19_v34 = vld [vmem:[%s485_s1] sm:$0xff]  ;;  %v93_v38 = vld [vmem:[%s486_s2 + $0x10] sm:$0xff] }
   0xd   :  { %76 = vmatpush.msra.mxu1 %v45_v11  ;;  %v35_v35 = vld [vmem:[%s485_s1 + $0x80] sm:$0xff]  ;;  %v18_v37 = vld [vmem:[%s487_s0 + $0x8] sm:$0xff]  ;;  %v94_v39 = vld [vmem:[%s486_s2 + $0x18] sm:$0xff]  ;;  %117 = vmatpush.msra.mxu2 %v93_v38 }
   0xe   :  { %57 = vmatpush.msra.mxu0 %v28_v12  ;;  %v17_v36 = vld [vmem:[%s487_s0] sm:$0xff]  ;;  %137 = vmatpush.msra.mxu3 %v94_v39  ;;  %v92_v41 = vld [vmem:[%s486_s2 + $0x8] sm:$0xff]  ;;  %v182_v45 = vld [vmem:[%s488_s3 + $0x18] sm:$0xff] }
   0xf   :  { %77 = vmatpush.msra.mxu1 %v44_v13  ;;  %v91_v40 = vld [vmem:[%s486_s2] sm:$0xff]  ;;  %v181_v46 = vld [vmem:[%s488_s3 + $0x10] sm:$0xff]  ;;  %v180_v47 = vld [vmem:[%s488_s3 + $0x8] sm:$0xff] }
  0x10   :  { %58 = vmatpush.msra.mxu0 %v27_v14  ;;  %118 = vmatpush.msra.mxu2 %v91_v40  ;;  %v179_v48 = vld [vmem:[%s488_s3] sm:$0xff] }
  0x11   :  { %78 = vmatpush.msra.mxu1 %v43_v17  ;;  %138 = vmatpush.msra.mxu3 %v92_v41 }
  0x12   :  { %59 = vmatpush.msra.mxu0 %v26_v20  ;;  %219 = vmatpush.msrb.mxu2 %v182_v45 }
  0x13   :  { %79 = vmatpush.msra.mxu1 %v42_v21  ;;  %270 = vmatpush.msrb.mxu3 %v182_v45 }
  0x14   :  { %60 = vmatpush.msra.mxu0 %v25_v22  ;;  %220 = vmatpush.msrb.mxu2 %v181_v46 }
  0x15   :  { %80 = vmatpush.msra.mxu1 %v41_v23  ;;  %271 = vmatpush.msrb.mxu3 %v181_v46 }
  0x16   :  { %61 = vmatpush.msra.mxu0 %v24_v24  ;;  %221 = vmatpush.msrb.mxu2 %v180_v47 }
  0x17   :  { %81 = vmatpush.msra.mxu1 %v40_v25  ;;  %272 = vmatpush.msrb.mxu3 %v180_v47 }
  0x18   :  { %62 = vmatpush.msra.mxu0 %v23_v26  ;;  %222 = vmatpush.msrb.mxu2 %v179_v48 }
  0x19   :  { %82 = vmatpush.msra.mxu1 %v39_v27  ;;  %273 = vmatpush.msrb.mxu3 %v179_v48 }
  0x1a   :  { %63 = vmatpush.msra.mxu0 %v22_v28 }
  0x1b   :  { %83 = vmatpush.msra.mxu1 %v38_v29 }
  0x1c   :  { %64 = vmatpush.msra.mxu0 %v21_v30 }
  0x1d   :  { %84 = vmatpush.msra.mxu1 %v37_v31 }
  0x1e   :  { %65 = vmatpush.msra.mxu0 %v20_v32 }
  0x1f   :  { %85 = vmatpush.msra.mxu1 %v36_v33 }
  0x20   :  { %66 = vmatpush.msra.mxu0 %v19_v34 }
  0x21   :  { %86 = vmatpush.msra.mxu1 %v35_v35  ;;  %67 = vmatmul.f32.vlgmr.msra.gmra.mxu0 %v17_v36 }
  0x22   :  { %87 = vmatmul.f32.vlgmr.msra.gmra.mxu1 %v18_v37 }
  0x9e   :  { %v68_v42 = vpop.f32.mrf.mxu0 }
  0x9f   :  { %v88_v43 = vpop.f32.mrf.mxu1 }
  0xa0   :  { %v89_v44 = vadd.f32 %v88_v43, %v68_v42 }
  0xa2   :  { %260 = vmatmul.msk.f32.vlgmr.msra.gmra.mxu2 %vm99_vm0, %v89_v44  ;;  %261 = vmatmul.msk.f32.vlgmr.msra.gmra.mxu3 %vm99_vm0, %v89_v44 }
 0x125   :  { %v120_v49 = vpop.f32.mrf.mxu2  ;;  %v140_v50 = vpop.f32.mrf.mxu3 }
 0x126   :  { %143 = vst.msk [vmem:[#allocation2] sm:$0xff] %vm99_vm0, %v120_v49  ;;  %153 = vrot.lane.b32.xlu2 %v120_v49, %s277_s26  ;;  %149 = vrot.lane.b32.xlu1 %v120_v49, %s278_s27 }
 0x127   :  { %157 = vst.msk [vmem:[#allocation2 + $0x20] sm:$0xff] %vm99_vm0, %v140_v50  ;;  %145 = vrot.lane.b32.xlu0 %v120_v49, %s279_s28 }
 0x12d   :  { %v171_v51 = vld [vmem:[#allocation2] sm:$0xff] }
 0x12e   :  { %v175_v52 = vld [vmem:[#allocation2 + $0x20] sm:$0xff]  ;;  %167 = vrot.lane.b32.xlu2 %v140_v50, %s277_s26  ;;  %163 = vrot.lane.b32.xlu1 %v140_v50, %s278_s27 }
 0x12f   :  { %266 = vmatmul.msk.f32.vlgmr.msrb.gmra.mxu3 %vm99_vm0, %v175_v52  ;;  %159 = vrot.lane.b32.xlu0 %v140_v50, %s279_s28 }
 0x130   :  { %262 = vmatmul.msk.f32.vlgmr.msrb.gmra.mxu2 %vm99_vm0, %v171_v51 }
 0x180   :  { %v154_v53 = vpop.permute.xlu2 %153 }
 0x181   :  { %156 = vst.msk [vmem:[#allocation2 + $0x18] sm:$0xff] %vm99_vm0, %v154_v53 }
 0x188   :  { %v168_v54 = vpop.permute.xlu2 %167  ;;  %v174_v62 = vld [vmem:[#allocation2 + $0x18] sm:$0xff] }
 0x189   :  { %170 = vst.msk [vmem:[#allocation2 + $0x38] sm:$0xff] %vm99_vm0, %v168_v54 }
 0x190   :  { %v178_v2 = vld [vmem:[#allocation2 + $0x38] sm:$0xff] }
 0x198   :  { %v150_v55 = vpop.permute.xlu1 %149 }
 0x199   :  { %152 = vst.msk [vmem:[#allocation2 + $0x10] sm:$0xff] %vm99_vm0, %v150_v55  ;;  %v146_v56 = vpop.permute.xlu0 %145 }
 0x19a   :  { %148 = vst.msk [vmem:[#allocation2 + $0x8] sm:$0xff] %vm99_vm0, %v146_v56 }
 0x1a0   :  { %v164_v57 = vpop.permute.xlu1 %163  ;;  %v173_v60 = vld [vmem:[#allocation2 + $0x10] sm:$0xff] }
 0x1a1   :  { %166 = vst.msk [vmem:[#allocation2 + $0x30] sm:$0xff] %vm99_vm0, %v164_v57  ;;  %v160_v58 = vpop.permute.xlu0 %159  ;;  %v172_v59 = vld [vmem:[#allocation2 + $0x8] sm:$0xff] }
 0x1a2   :  { %162 = vst.msk [vmem:[#allocation2 + $0x28] sm:$0xff] %vm99_vm0, %v160_v58  ;;  %263 = vmatmul.msk.f32.gmra.mxu2 %vm99_vm0, %v172_v59 }
 0x1a8   :  { %v177_v63 = vld [vmem:[#allocation2 + $0x30] sm:$0xff] }
 0x1a9   :  { %v176_v61 = vld [vmem:[#allocation2 + $0x28] sm:$0xff] }
 0x1aa   :  { %264 = vmatmul.msk.f32.gmra.mxu2 %vm99_vm0, %v173_v60  ;;  %267 = vmatmul.msk.f32.gmra.mxu3 %vm99_vm0, %v176_v61 }
 0x1b2   :  { %265 = vmatmul.msk.f32.gmra.mxu2 %vm99_vm0, %v174_v62  ;;  %v236_v0 = vpop.f32.mrf.mxu3  ;;  %268 = vmatmul.msk.f32.gmra.mxu3 %vm99_vm0, %v177_v63 }
 0x1b3   :  { %v224_v1 = vpop.f32.mrf.mxu2  ;;  %252 = vst [vmem:[%s489_s4 + $0x20] sm:$0xff] %v236_v0 }
 0x1b4   :  { %248 = vst [vmem:[%s489_s4] sm:$0xff] %v224_v1 }
 0x1ba   :  { %269 = vmatmul.msk.f32.gmra.mxu3 %vm99_vm0, %v178_v2 }
 0x225   :  { %v227_v3 = vpop.f32.mrf.mxu2 }
 0x226   :  { %249 = vst [vmem:[%s489_s4 + $0x8] sm:$0xff] %v227_v3 }
 0x22d   :  { %v230_v4 = vpop.f32.mrf.mxu2  ;;  %v239_v5 = vpop.f32.mrf.mxu3 }
 0x22e   :  { %250 = vst [vmem:[%s489_s4 + $0x10] sm:$0xff] %v230_v4 }
 0x22f   :  { %253 = vst [vmem:[%s489_s4 + $0x28] sm:$0xff] %v239_v5 }
 0x235   :  { %v233_v6 = vpop.f32.mrf.mxu2  ;;  %v242_v7 = vpop.f32.mrf.mxu3 }
 0x236   :  { %251 = vst [vmem:[%s489_s4 + $0x18] sm:$0xff] %v233_v6 }
 0x237   :  { %254 = vst [vmem:[%s489_s4 + $0x30] sm:$0xff] %v242_v7 }
 0x23d   :  { %v245_v8 = vpop.f32.mrf.mxu3 }
 0x23e   :  { %255 = vst [vmem:[%s489_s4 + $0x38] sm:$0xff] %v245_v8 }

</bundles_post_ra>
